<compile_context>
chip_gen: v5e
topology: v5e:2x2
jax: 0.10.0
libtpu: 0.0.40
codegen_flags: <defaults>
</compile_context>

<pallas_src>
import functools

import jax
import jax.numpy as jnp
from jax.experimental import pallas as pl
from jax.experimental.pallas import tpu as pltpu

_LANE = 128
_MIB = 1024 * 1024


def _kl_pixelwise_kernel(s_ref, t_ref, out_ref,
                         m_s_ref, z_s_ref, m_t_ref, z_t_ref, acc_ref,
                         *, inv_temp, grid_d, tail_valid, mask_tail):
    """Online two-softmax KL accumulation over D tiles of the flattened axis.

    Per sub-row (student s, teacher t, both scaled by 1/Temp) the scratch refs hold:
      m_s, z_s : running max / sum-of-exp of the student logits
      m_t, z_t : running max / sum-of-exp of the teacher logits
      acc      : running sum of exp(t - m_t) * (t - s)
    """
    k = pl.program_id(1)   # reduction axis over D tiles (last grid axis)

    @pl.when(k == 0)
    def _():
        neg_inf = jnp.full(m_s_ref.shape, -jnp.inf, jnp.float32)
        m_s_ref[...] = neg_inf
        m_t_ref[...] = neg_inf
        z_s_ref[...] = jnp.zeros(z_s_ref.shape, jnp.float32)
        z_t_ref[...] = jnp.zeros(z_t_ref.shape, jnp.float32)
        acc_ref[...] = jnp.zeros(acc_ref.shape, jnp.float32)

    def update(apply_mask):
        s = s_ref[...].astype(jnp.float32) * inv_temp
        t = t_ref[...].astype(jnp.float32) * inv_temp
        if apply_mask:
            # Large-negative finite fill: exp() underflows to exactly 0 and
            # (t - s) is exactly 0 on masked lanes.
            col = jax.lax.broadcasted_iota(jnp.int32, s.shape, 1)
            keep = col < tail_valid
            neg = jnp.float32(-1e30)
            s = jnp.where(keep, s, neg)
            t = jnp.where(keep, t, neg)
        m_s_new = jnp.maximum(m_s_ref[...], jnp.max(s, axis=1, keepdims=True))
        m_t_new = jnp.maximum(m_t_ref[...], jnp.max(t, axis=1, keepdims=True))
        alpha_s = jnp.exp(m_s_ref[...] - m_s_new)   # 0 on the first tile
        alpha_t = jnp.exp(m_t_ref[...] - m_t_new)
        e_s = jnp.exp(s - m_s_new)
        e_t = jnp.exp(t - m_t_new)
        z_s_ref[...] = alpha_s * z_s_ref[...] + jnp.sum(e_s, axis=1, keepdims=True)
        z_t_ref[...] = alpha_t * z_t_ref[...] + jnp.sum(e_t, axis=1, keepdims=True)
        acc_ref[...] = alpha_t * acc_ref[...] + jnp.sum(e_t * (t - s), axis=1,
                                                        keepdims=True)
        m_s_ref[...] = m_s_new
        m_t_ref[...] = m_t_new

    if mask_tail:
        # Only the last D tile pays for the masking (static duplication under
        # pl.when, NOT a per-tile where on every tile).
        @pl.when(k < grid_d - 1)
        def _():
            update(False)

        @pl.when(k == grid_d - 1)
        def _():
            update(True)
    else:
        update(False)

    # Single packed write-out once per row block, on the last reduction step.
    @pl.when(k == grid_d - 1)
    def _():
        out_ref[:, 0:1] = m_s_ref[...]
        out_ref[:, 1:2] = z_s_ref[...]
        out_ref[:, 2:3] = m_t_ref[...]
        out_ref[:, 3:4] = z_t_ref[...]
        out_ref[:, 4:5] = acc_ref[...]
        out_ref[:, 5:8] = jnp.zeros((out_ref.shape[0], 3), jnp.float32)


def _pick_subrow_factor(n, d, min_sub, want_groups=1):
    """Split each original row into R contiguous sub-rows (free row-major view)
    so n*R is a multiple of the sublane count (and, on v7x, of 2x sublanes so
    the rows can be split across both TensorCores)."""
    if d < _LANE:
        return 1
    targets = [min_sub * want_groups, min_sub] if want_groups > 1 else [min_sub]
    for tgt in targets:
        if n % tgt == 0:
            return 1
        for r in range(2, 8 * tgt + 1):
            if d % r == 0 and d // r >= _LANE and (n * r) % tgt == 0:
                return r
    for r in range(min_sub, 1, -1):            # partial-fill fallback
        if d % r == 0 and d // r >= _LANE:
            return r
    return 1


def _device_config():
    """Per-generation tiling/VMEM config; safe fallback if detection fails."""
    kind = ""
    try:
        kind = jax.devices()[0].device_kind.lower()
    except Exception:
        pass
    if ("v7" in kind) or ("7x" in kind):
        # 2 TensorCores/chip, 64 MiB VMEM/TC: split rows, keep blocks modest.
        return dict(row_groups=2, target_block_bytes=4 * _MIB, vmem_cap=56 * _MIB)
    # v5e / v6e: 1 TC, 128 MiB VMEM, HBM-streaming bound: big blocks, 1 row block.
    return dict(row_groups=1, target_block_bytes=8 * _MIB, vmem_cap=100 * _MIB)


def criterion_pixel_wise(preds_S, preds_T, *, temp=2.0,
                         target_block_bytes=None, num_row_blocks=None):
    """Pallas implementation of CriterionPixelWise.forward (KL distillation loss)."""
    assert preds_S.shape == preds_T.shape, \
        "the output dim of teacher and student differ"

    cfg = _device_config()
    if target_block_bytes is None:
        target_block_bytes = cfg["target_block_bytes"]
    if num_row_blocks is None:
        num_row_blocks = cfg["row_groups"]
    vmem_cap = cfg["vmem_cap"]

    n = preds_S.shape[0]
    d = 1
    for s in preds_S.shape[1:]:
        d *= s

    itemsize = jnp.dtype(preds_S.dtype).itemsize
    min_sub = max(8, 32 // itemsize)           # f32: 8 sublanes, bf16: 16

    r = _pick_subrow_factor(n, d, min_sub, want_groups=num_row_blocks)
    n_eff = n * r
    d_eff = d // r

    # Row-parallel split (v7x megacore); fall back to one block if the row
    # tiles can't be sublane-aligned.
    if num_row_blocks > 1 and n_eff % (num_row_blocks * min_sub) != 0:
        num_row_blocks = 1
    row_tile = n_eff // num_row_blocks

    # Flatten NCHW -> (N*R, D/R); contiguous row-major, same memory order as
    # torch .view(N, -1).  Teacher is detached in torch; forward is identical.
    s2 = preds_S.reshape(n_eff, d_eff)
    t2 = preds_T.reshape(n_eff, d_eff)

    # ---- D-tile selection (dtype- and VMEM-aware) --------------------------
    td_target = max(_LANE,
                    (target_block_bytes // (row_tile * itemsize)) // _LANE * _LANE)
    per_elem_vmem = 4 * itemsize + 6 * 4       # 2 double-buffered inputs + ~6 f32 temps
    td_cap = max(_LANE,
                 ((vmem_cap - 8 * _MIB) // (row_tile * per_elem_vmem)) // _LANE * _LANE)
    td_max = min(td_target, td_cap)

    if d_eff <= td_max:
        td, grid_d, mask_tail = d_eff, 1, False
    else:
        td = 0
        if d_eff % _LANE == 0:                 # largest 128-multiple divisor <= td_max
            for m in range(td_max // _LANE, 0, -1):
                if d_eff % (m * _LANE) == 0:
                    td = m * _LANE
                    break
        if td == 0 or td < td_max // 2:        # no (good) divisor: masked tail tile
            td = td_max
        grid_d = pl.cdiv(d_eff, td)
        mask_tail = (d_eff % td) != 0
    tail_valid = d_eff - (grid_d - 1) * td

    block_elems = row_tile * td
    vmem_limit = 4 * block_elems * itemsize + 6 * block_elems * 4 + 8 * _MIB
    vmem_limit = int(max(32 * _MIB, min(vmem_limit, vmem_cap)))

    kernel = functools.partial(
        _kl_pixelwise_kernel,
        inv_temp=float(1.0 / temp), grid_d=grid_d,
        tail_valid=tail_valid, mask_tail=mask_tail)

    packed = pl.pallas_call(
        kernel,
        out_shape=jax.ShapeDtypeStruct((n_eff, 8), jnp.float32),
        grid_spec=pltpu.PrefetchScalarGridSpec(
            num_scalar_prefetch=0,
            grid=(num_row_blocks, grid_d),
            in_specs=[
                pl.BlockSpec((row_tile, td), lambda i, k: (i, k)),
                pl.BlockSpec((row_tile, td), lambda i, k: (i, k)),
            ],
            out_specs=pl.BlockSpec((row_tile, 8), lambda i, k: (i, 0)),
            scratch_shapes=[pltpu.VMEM((row_tile, 1), jnp.float32)] * 5,
        ),
        compiler_params=pltpu.CompilerParams(
            dimension_semantics=("parallel", "arbitrary"),
            vmem_limit_bytes=vmem_limit),
        cost_estimate=pl.CostEstimate(
            flops=12 * n * d,
            transcendentals=3 * n * d,
            bytes_accessed=2 * itemsize * n * d + 4 * 8 * n_eff),
    )(s2, t2)

    # ---- merge the R sub-row partials of each original row (tiny, once) ----
    m_s = packed[:, 0].reshape(n, r)
    z_s = packed[:, 1].reshape(n, r)
    m_t = packed[:, 2].reshape(n, r)
    z_t = packed[:, 3].reshape(n, r)
    acc = packed[:, 4].reshape(n, r)

    m_s_row = jnp.max(m_s, axis=1, keepdims=True)
    m_t_row = jnp.max(m_t, axis=1, keepdims=True)
    z_s_row = jnp.sum(z_s * jnp.exp(m_s - m_s_row), axis=1, keepdims=True)
    z_t_row = jnp.sum(z_t * jnp.exp(m_t - m_t_row), axis=1, keepdims=True)
    acc_row = jnp.sum(acc * jnp.exp(m_t - m_t_row), axis=1, keepdims=True)

    kl_rows = (acc_row / z_t_row
               + m_s_row - m_t_row
               + jnp.log(z_s_row) - jnp.log(z_t_row))           # (N, 1)
    return jnp.sum(kl_rows) / jnp.float32(n)                    # 'batchmean'


def _reference_loss(preds_S, preds_T, temp=2.0):
    n = preds_S.shape[0]
    s = preds_S.reshape(n, -1) / temp
    t = preds_T.reshape(n, -1) / temp
    log_p_s = jax.nn.log_softmax(s, axis=1)
    log_p_t = jax.nn.log_softmax(t, axis=1)
    p_t = jnp.exp(log_p_t)
    return jnp.sum(p_t * (log_p_t - log_p_s)) / n


if __name__ == "__main__":
    key = jax.random.PRNGKey(0)
    k1, k2, k3, k4, k5, k6 = jax.random.split(key, 6)

    # 1) Segmentation-like logits: batch=2, classes=4, spatial=16x16 (NCHW);
    #    single full-width tile (no masking).
    preds_S = jax.random.normal(k1, (2, 4, 16, 16), dtype=jnp.float32)
    preds_T = jax.random.normal(k2, (2, 4, 16, 16), dtype=jnp.float32)
    loss = jax.block_until_ready(criterion_pixel_wise(preds_S, preds_T))
    ref = jax.block_until_ready(_reference_loss(preds_S, preds_T))
    assert jnp.allclose(loss, ref, rtol=1e-4, atol=1e-6), (loss, ref)

    # 2) Multi-tile with an unavoidable tail: only the last tile is masked.
    s_odd = jax.random.normal(k3, (2, 4, 24, 40), dtype=jnp.float32)
    t_odd = jax.random.normal(k4, (2, 4, 24, 40), dtype=jnp.float32)
    loss2 = jax.block_until_ready(
        criterion_pixel_wise(s_odd, t_odd, target_block_bytes=8 * 1024))
    ref2 = jax.block_until_ready(_reference_loss(s_odd, t_odd))
    assert jnp.allclose(loss2, ref2, rtol=1e-4, atol=1e-6), (loss2, ref2)

    # 3) Multi-tile where a 128-multiple divisor tile exists (no masking at all).
    s_div = jax.random.normal(k5, (2, 4, 32, 32), dtype=jnp.float32)
    t_div = jax.random.normal(k6, (2, 4, 32, 32), dtype=jnp.float32)
    loss3 = jax.block_until_ready(
        criterion_pixel_wise(s_div, t_div, target_block_bytes=8 * 1024))
    ref3 = jax.block_until_ready(_reference_loss(s_div, t_div))
    assert jnp.allclose(loss3, ref3, rtol=1e-4, atol=1e-6), (loss3, ref3)

    # 4) bf16 inputs streamed at native width (cast to f32 in-kernel).
    s_bf = preds_S.astype(jnp.bfloat16)
    t_bf = preds_T.astype(jnp.bfloat16)
    loss4 = jax.block_until_ready(criterion_pixel_wise(s_bf, t_bf))
    ref4 = jax.block_until_ready(
        _reference_loss(s_bf.astype(jnp.float32), t_bf.astype(jnp.float32)))
    assert jnp.allclose(loss4, ref4, rtol=1e-3, atol=1e-5), (loss4, ref4)

    print("KERNEL_OK")
</pallas_src>

<mosaic_0001>
module attributes {stable_mosaic.version = 11 : i64} {
  func.func @_kl_pixelwise_kernel(%arg0: i32, %arg1: i32, %arg2: memref<8x256xf32, #tpu.memory_space<vmem>>, %arg3: memref<8x256xf32, #tpu.memory_space<vmem>>, %arg4: memref<8x8xf32, #tpu.memory_space<vmem>>, %arg5: memref<8x1xf32, #tpu.memory_space<vmem>>, %arg6: memref<8x1xf32, #tpu.memory_space<vmem>>, %arg7: memref<8x1xf32, #tpu.memory_space<vmem>>, %arg8: memref<8x1xf32, #tpu.memory_space<vmem>>, %arg9: memref<8x1xf32, #tpu.memory_space<vmem>>) attributes {dimension_semantics = [#tpu.dimension_semantics<parallel>, #tpu.dimension_semantics<arbitrary>], iteration_bounds = array<i64: 1, 1>, scalar_prefetch = 0 : i64, scratch_operands = 5 : i64, tpu.core_type = #tpu.core_type<tc>, window_params = [{transform_indices = @transform_0, window_bounds = array<i64: 8, 256>}, {transform_indices = @transform_1, window_bounds = array<i64: 8, 256>}, {transform_indices = @transform_2, window_bounds = array<i64: 8, 8>}]} {
    %c0_i32 = arith.constant 0 : i32
    %0 = arith.cmpi eq, %arg1, %c0_i32 : i32
    %1 = arith.extui %0 : i1 to i32
    %c0_i32_0 = arith.constant 0 : i32
    %2 = arith.cmpi ne, %1, %c0_i32_0 : i32
    scf.if %2 {
      %cst_36 = arith.constant 0xFF800000 : f32
      %54 = vector.broadcast %cst_36 : f32 to vector<8x1xf32>
      %c0_37 = arith.constant 0 : index
      %c0_38 = arith.constant 0 : index
      %55 = vector.load %arg5[%c0_37, %c0_38] : memref<8x1xf32, #tpu.memory_space<vmem>>, vector<8x1xf32>
      tpu.vector_store %arg5[%c0_37, %c0_38], %54 {strides = array<i32>} : memref<8x1xf32, #tpu.memory_space<vmem>>, vector<8x1xf32>,
      %c0_39 = arith.constant 0 : index
      %c0_40 = arith.constant 0 : index
      %56 = vector.load %arg7[%c0_39, %c0_40] : memref<8x1xf32, #tpu.memory_space<vmem>>, vector<8x1xf32>
      tpu.vector_store %arg7[%c0_39, %c0_40], %54 {strides = array<i32>} : memref<8x1xf32, #tpu.memory_space<vmem>>, vector<8x1xf32>,
      %cst_41 = arith.constant 0.000000e+00 : f32
      %57 = vector.broadcast %cst_41 : f32 to vector<8x1xf32>
      %c0_42 = arith.constant 0 : index
      %c0_43 = arith.constant 0 : index
      %58 = vector.load %arg6[%c0_42, %c0_43] : memref<8x1xf32, #tpu.memory_space<vmem>>, vector<8x1xf32>
      tpu.vector_store %arg6[%c0_42, %c0_43], %57 {strides = array<i32>} : memref<8x1xf32, #tpu.memory_space<vmem>>, vector<8x1xf32>,
      %cst_44 = arith.constant 0.000000e+00 : f32
      %59 = vector.broadcast %cst_44 : f32 to vector<8x1xf32>
      %c0_45 = arith.constant 0 : index
      %c0_46 = arith.constant 0 : index
      %60 = vector.load %arg8[%c0_45, %c0_46] : memref<8x1xf32, #tpu.memory_space<vmem>>, vector<8x1xf32>
      tpu.vector_store %arg8[%c0_45, %c0_46], %59 {strides = array<i32>} : memref<8x1xf32, #tpu.memory_space<vmem>>, vector<8x1xf32>,
      %cst_47 = arith.constant 0.000000e+00 : f32
      %61 = vector.broadcast %cst_47 : f32 to vector<8x1xf32>
      %c0_48 = arith.constant 0 : index
      %c0_49 = arith.constant 0 : index
      %62 = vector.load %arg9[%c0_48, %c0_49] : memref<8x1xf32, #tpu.memory_space<vmem>>, vector<8x1xf32>
      tpu.vector_store %arg9[%c0_48, %c0_49], %61 {strides = array<i32>} : memref<8x1xf32, #tpu.memory_space<vmem>>, vector<8x1xf32>,
    } else {
    }
    %c0 = arith.constant 0 : index
    %c0_1 = arith.constant 0 : index
    %3 = vector.load %arg2[%c0, %c0_1] : memref<8x256xf32, #tpu.memory_space<vmem>>, vector<8x256xf32>
    %cst = arith.constant 5.000000e-01 : f32
    %4 = vector.broadcast %cst : f32 to vector<8x256xf32>
    %5 = arith.mulf %3, %4 : vector<8x256xf32>
    %c0_2 = arith.constant 0 : index
    %c0_3 = arith.constant 0 : index
    %6 = vector.load %arg3[%c0_2, %c0_3] : memref<8x256xf32, #tpu.memory_space<vmem>>, vector<8x256xf32>
    %cst_4 = arith.constant 5.000000e-01 : f32
    %7 = vector.broadcast %cst_4 : f32 to vector<8x256xf32>
    %8 = arith.mulf %6, %7 : vector<8x256xf32>
    %c0_5 = arith.constant 0 : index
    %c0_6 = arith.constant 0 : index
    %9 = vector.load %arg5[%c0_5, %c0_6] : memref<8x1xf32, #tpu.memory_space<vmem>>, vector<8x1xf32>
    %cst_7 = arith.constant dense<0xFF800000> : vector<8xf32>
    %10 = vector.multi_reduction <maximumf>, %5, %cst_7 [1] : vector<8x256xf32> to vector<8xf32>
    %11 = vector.shape_cast %10 : vector<8xf32> to vector<8x1xf32>
    %12 = arith.maximumf %9, %11 : vector<8x1xf32>
    %c0_8 = arith.constant 0 : index
    %c0_9 = arith.constant 0 : index
    %13 = vector.load %arg7[%c0_8, %c0_9] : memref<8x1xf32, #tpu.memory_space<vmem>>, vector<8x1xf32>
    %cst_10 = arith.constant dense<0xFF800000> : vector<8xf32>
    %14 = vector.multi_reduction <maximumf>, %8, %cst_10 [1] : vector<8x256xf32> to vector<8xf32>
    %15 = vector.shape_cast %14 : vector<8xf32> to vector<8x1xf32>
    %16 = arith.maximumf %13, %15 : vector<8x1xf32>
    %c0_11 = arith.constant 0 : index
    %c0_12 = arith.constant 0 : index
    %17 = vector.load %arg5[%c0_11, %c0_12] : memref<8x1xf32, #tpu.memory_space<vmem>>, vector<8x1xf32>
    %18 = arith.subf %17, %12 : vector<8x1xf32>
    %19 = math.exp %18 : vector<8x1xf32>
    %c0_13 = arith.constant 0 : index
    %c0_14 = arith.constant 0 : index
    %20 = vector.load %arg7[%c0_13, %c0_14] : memref<8x1xf32, #tpu.memory_space<vmem>>, vector<8x1xf32>
    %21 = arith.subf %20, %16 : vector<8x1xf32>
    %22 = math.exp %21 : vector<8x1xf32>
    %23 = vector.broadcast %12 : vector<8x1xf32> to vector<8x256xf32>
    %24 = arith.subf %5, %23 : vector<8x256xf32>
    %25 = math.exp %24 : vector<8x256xf32>
    %26 = vector.broadcast %16 : vector<8x1xf32> to vector<8x256xf32>
    %27 = arith.subf %8, %26 : vector<8x256xf32>
    %28 = math.exp %27 : vector<8x256xf32>
    %c0_15 = arith.constant 0 : index
    %c0_16 = arith.constant 0 : index
    %29 = vector.load %arg6[%c0_15, %c0_16] : memref<8x1xf32, #tpu.memory_space<vmem>>, vector<8x1xf32>
    %30 = arith.mulf %19, %29 : vector<8x1xf32>
    %cst_17 = arith.constant dense<0.000000e+00> : vector<8xf32>
    %31 = vector.multi_reduction <add>, %25, %cst_17 [1] : vector<8x256xf32> to vector<8xf32>
    %32 = vector.shape_cast %31 : vector<8xf32> to vector<8x1xf32>
    %33 = arith.addf %30, %32 : vector<8x1xf32>
    %c0_18 = arith.constant 0 : index
    %c0_19 = arith.constant 0 : index
    %34 = vector.load %arg6[%c0_18, %c0_19] : memref<8x1xf32, #tpu.memory_space<vmem>>, vector<8x1xf32>
    tpu.vector_store %arg6[%c0_18, %c0_19], %33 {strides = array<i32>} : memref<8x1xf32, #tpu.memory_space<vmem>>, vector<8x1xf32>,
    %c0_20 = arith.constant 0 : index
    %c0_21 = arith.constant 0 : index
    %35 = vector.load %arg8[%c0_20, %c0_21] : memref<8x1xf32, #tpu.memory_space<vmem>>, vector<8x1xf32>
    %36 = arith.mulf %22, %35 : vector<8x1xf32>
    %cst_22 = arith.constant dense<0.000000e+00> : vector<8xf32>
    %37 = vector.multi_reduction <add>, %28, %cst_22 [1] : vector<8x256xf32> to vector<8xf32>
    %38 = vector.shape_cast %37 : vector<8xf32> to vector<8x1xf32>
    %39 = arith.addf %36, %38 : vector<8x1xf32>
    %c0_23 = arith.constant 0 : index
    %c0_24 = arith.constant 0 : index
    %40 = vector.load %arg8[%c0_23, %c0_24] : memref<8x1xf32, #tpu.memory_space<vmem>>, vector<8x1xf32>
    tpu.vector_store %arg8[%c0_23, %c0_24], %39 {strides = array<i32>} : memref<8x1xf32, #tpu.memory_space<vmem>>, vector<8x1xf32>,
    %c0_25 = arith.constant 0 : index
    %c0_26 = arith.constant 0 : index
    %41 = vector.load %arg9[%c0_25, %c0_26] : memref<8x1xf32, #tpu.memory_space<vmem>>, vector<8x1xf32>
    %42 = arith.mulf %22, %41 : vector<8x1xf32>
    %43 = arith.subf %8, %5 : vector<8x256xf32>
    %44 = arith.mulf %28, %43 : vector<8x256xf32>
    %cst_27 = arith.constant dense<0.000000e+00> : vector<8xf32>
    %45 = vector.multi_reduction <add>, %44, %cst_27 [1] : vector<8x256xf32> to vector<8xf32>
    %46 = vector.shape_cast %45 : vector<8xf32> to vector<8x1xf32>
    %47 = arith.addf %42, %46 : vector<8x1xf32>
    %c0_28 = arith.constant 0 : index
    %c0_29 = arith.constant 0 : index
    %48 = vector.load %arg9[%c0_28, %c0_29] : memref<8x1xf32, #tpu.memory_space<vmem>>, vector<8x1xf32>
    tpu.vector_store %arg9[%c0_28, %c0_29], %47 {strides = array<i32>} : memref<8x1xf32, #tpu.memory_space<vmem>>, vector<8x1xf32>,
    %c0_30 = arith.constant 0 : index
    %c0_31 = arith.constant 0 : index
    %49 = vector.load %arg5[%c0_30, %c0_31] : memref<8x1xf32, #tpu.memory_space<vmem>>, vector<8x1xf32>
    tpu.vector_store %arg5[%c0_30, %c0_31], %12 {strides = array<i32>} : memref<8x1xf32, #tpu.memory_space<vmem>>, vector<8x1xf32>,
    %c0_32 = arith.constant 0 : index
    %c0_33 = arith.constant 0 : index
    %50 = vector.load %arg7[%c0_32, %c0_33] : memref<8x1xf32, #tpu.memory_space<vmem>>, vector<8x1xf32>
    tpu.vector_store %arg7[%c0_32, %c0_33], %16 {strides = array<i32>} : memref<8x1xf32, #tpu.memory_space<vmem>>, vector<8x1xf32>,
    %c0_i32_34 = arith.constant 0 : i32
    %51 = arith.cmpi eq, %arg1, %c0_i32_34 : i32
    %52 = arith.extui %51 : i1 to i32
    %c0_i32_35 = arith.constant 0 : i32
    %53 = arith.cmpi ne, %52, %c0_i32_35 : i32
    scf.if %53 {
      %c0_36 = arith.constant 0 : index
      %c0_37 = arith.constant 0 : index
      %54 = vector.load %arg5[%c0_36, %c0_37] : memref<8x1xf32, #tpu.memory_space<vmem>>, vector<8x1xf32>
      %c0_38 = arith.constant 0 : index
      %c0_39 = arith.constant 0 : index
      %55 = vector.load %arg4[%c0_38, %c0_39] : memref<8x8xf32, #tpu.memory_space<vmem>>, vector<8x1xf32>
      tpu.vector_store %arg4[%c0_38, %c0_39], %54 {strides = array<i32>} : memref<8x8xf32, #tpu.memory_space<vmem>>, vector<8x1xf32>,
      %c0_40 = arith.constant 0 : index
      %c0_41 = arith.constant 0 : index
      %56 = vector.load %arg6[%c0_40, %c0_41] : memref<8x1xf32, #tpu.memory_space<vmem>>, vector<8x1xf32>
      %c0_42 = arith.constant 0 : index
      %c1 = arith.constant 1 : index
      %57 = vector.load %arg4[%c0_42, %c1] : memref<8x8xf32, #tpu.memory_space<vmem>>, vector<8x1xf32>
      tpu.vector_store %arg4[%c0_42, %c1], %56 {strides = array<i32>} : memref<8x8xf32, #tpu.memory_space<vmem>>, vector<8x1xf32>,
      %c0_43 = arith.constant 0 : index
      %c0_44 = arith.constant 0 : index
      %58 = vector.load %arg7[%c0_43, %c0_44] : memref<8x1xf32, #tpu.memory_space<vmem>>, vector<8x1xf32>
      %c0_45 = arith.constant 0 : index
      %c2 = arith.constant 2 : index
      %59 = vector.load %arg4[%c0_45, %c2] : memref<8x8xf32, #tpu.memory_space<vmem>>, vector<8x1xf32>
      tpu.vector_store %arg4[%c0_45, %c2], %58 {strides = array<i32>} : memref<8x8xf32, #tpu.memory_space<vmem>>, vector<8x1xf32>,
      %c0_46 = arith.constant 0 : index
      %c0_47 = arith.constant 0 : index
      %60 = vector.load %arg8[%c0_46, %c0_47] : memref<8x1xf32, #tpu.memory_space<vmem>>, vector<8x1xf32>
      %c0_48 = arith.constant 0 : index
      %c3 = arith.constant 3 : index
      %61 = vector.load %arg4[%c0_48, %c3] : memref<8x8xf32, #tpu.memory_space<vmem>>, vector<8x1xf32>
      tpu.vector_store %arg4[%c0_48, %c3], %60 {strides = array<i32>} : memref<8x8xf32, #tpu.memory_space<vmem>>, vector<8x1xf32>,
      %c0_49 = arith.constant 0 : index
      %c0_50 = arith.constant 0 : index
      %62 = vector.load %arg9[%c0_49, %c0_50] : memref<8x1xf32, #tpu.memory_space<vmem>>, vector<8x1xf32>
      %c0_51 = arith.constant 0 : index
      %c4 = arith.constant 4 : index
      %63 = vector.load %arg4[%c0_51, %c4] : memref<8x8xf32, #tpu.memory_space<vmem>>, vector<8x1xf32>
      tpu.vector_store %arg4[%c0_51, %c4], %62 {strides = array<i32>} : memref<8x8xf32, #tpu.memory_space<vmem>>, vector<8x1xf32>,
      %cst_52 = arith.constant 0.000000e+00 : f32
      %64 = vector.broadcast %cst_52 : f32 to vector<8x3xf32>
      %c0_53 = arith.constant 0 : index
      %c5 = arith.constant 5 : index
      %65 = vector.load %arg4[%c0_53, %c5] : memref<8x8xf32, #tpu.memory_space<vmem>>, vector<8x3xf32>
      tpu.vector_store %arg4[%c0_53, %c5], %64 {strides = array<i32>} : memref<8x8xf32, #tpu.memory_space<vmem>>, vector<8x3xf32>,
    } else {
    }
    return
  }
  func.func @transform_0(%arg0: i32, %arg1: i32) -> (i32, i32) {
    %c0_i32 = arith.constant 0 : i32
    return %arg0, %arg1 : i32, i32
  }
  func.func @transform_1(%arg0: i32, %arg1: i32) -> (i32, i32) {
    %c0_i32 = arith.constant 0 : i32
    return %arg0, %arg1 : i32, i32
  }
  func.func @transform_2(%arg0: i32, %arg1: i32) -> (i32, i32) {
    %c0_i32 = arith.constant 0 : i32
    %c0_i32_0 = arith.constant 0 : i32
    return %arg0, %c0_i32 : i32, i32
  }
}

</mosaic_0001>

<bundles_post_ra>
// kernel: tpu_custom_call.1
= control target key start
LH: loop header
LB: loop body
LE: loop exit
PB: predicated region body
PF: predicated region fallthrough
CT: control target
= control target key end

     0   :  { %7 = vsyncpa [#allocation8], 0  ;;  %s328_s0 = inlined_call_operand.hbm [shape: f32[8,256], index: 0, kind: input, shape index: {}]   ;;  %s329_s1 = inlined_call_operand.hbm [shape: f32[8,256], index: 1, kind: input, shape index: {}]   ;;  %s330_s2 = inlined_call_operand.hbm [shape: f32[8,8], index: 2, kind: output, shape index: {}]  }
   0x1   :  { %8 = vsyncpa [#allocation11], 0 }
   0x2   :  { %9 = vsyncpa [#allocation9], 0  ;;  %s15_s11 = sshll.u32 %s328_s0, 4  ;;  %s279_s12 = smov [#allocation7]   ;;  %s16_s11 = int_to_ptr.hbm [resolvable:$true] %s15_s11 }
   0x3   :  { %s17_s13 = sshll.u32 %s279_s12, 4  ;;  %s26_s16 = sshll.u32 %s329_s1, 4  ;;  %s18_s13 = int_to_ptr.vmem [resolvable:$true] %s17_s13  ;;  %s27_s16 = int_to_ptr.hbm [resolvable:$true] %s26_s16 }
   0x4   :  { %20 = dma.hbm_to_vmem [thread:$0]  %s16_s11, 256, %s18_s13, [#allocation8]  }
   0x5   :  { %s280_s17 = smov [#allocation10]  }
   0x6   :  { %s28_s18 = sshll.u32 %s280_s17, 4  ;;  %s29_s18 = int_to_ptr.vmem [resolvable:$true] %s28_s18 }
   0x7   :  { %31 = dma.hbm_to_vmem [thread:$0]  %s27_s16, 256, %s29_s18, [#allocation11]  }
   0x8   :  { %273 = dma.done.wait [#allocation8], 256  }
   0x9   :  { %274 = vsyncadd [#allocation8], 4294967040 }
   0xa   :  { %275 = dma.done.wait [#allocation11], 256  }
   0xb   :  { %276 = vsyncadd [#allocation11], 4294967040  ;;  %vm44_vm0 = vcmask 7168   ;;  %v281_v0 = vmov -inf   ;;  %v50_v1 = vld [vmem:[#allocation7] sm:$0xff]  ;;  %v51_v2 = vld [vmem:[#allocation7 + $0x8] sm:$0xff] }
   0xc   :  { %45 = vst.msk [vmem:[#allocation2] sm:$0xff] %vm44_vm0, %v281_v0  ;;  %v52_v3 = vmul.f32 0.5, %v50_v1  ;;  %v53_v4 = vmul.f32 0.5, %v51_v2  ;;  %v54_v5 = vld [vmem:[#allocation10] sm:$0xff]  ;;  %v55_v6 = vld [vmem:[#allocation10 + $0x8] sm:$0xff]  ;;  %v282_v11 = vmov 0  }
   0xd   :  { %46 = vst.msk [vmem:[#allocation4] sm:$0xff] %vm44_vm0, %v281_v0  ;;  %v56_v8 = vmul.f32 0.5, %v54_v5  ;;  %v57_v9 = vmul.f32 0.5, %v55_v6  ;;  %187 = vset.pattern.permute.xlu1 %v282_v11  ;;  %188 = vset.pattern.permute.xlu0 %v282_v11  ;;  %v283_v12 = vmov 0.0   ;;  %s284_s0 = smov 2   ;;  %s285_s1 = smov 1  }
   0xe   :  { %v59_v7 = vmax.f32 %v52_v3, %v53_v4  ;;  %47 = vst.msk [vmem:[#allocation3] sm:$0xff] %vm44_vm0, %v283_v12  ;;  %s286_s19 = smov 3   ;;  %s287_s20 = smov 4   ;;  %vm134_vm1 = vcmask 15368   ;;  %vm141_vm2 = vcmask 23568   ;;  %vm148_vm3 = vcmask 31768  }
   0xf   :  { %v64_v10 = vmax.f32 %v56_v8, %v57_v9  ;;  %48 = vst.msk [vmem:[#allocation5] sm:$0xff] %vm44_vm0, %v283_v12  ;;  %v113_v35 = vsub.f32 %v56_v8, %v52_v3  ;;  %v114_v36 = vsub.f32 %v57_v9, %v53_v4  ;;  %s288_s21 = smov [#allocation12]   ;;  %s166_s25 = sshll.u32 %s330_s2, 4  ;;  %vm155_vm4 = vcmask 39968   ;;  %s167_s25 = int_to_ptr.hbm [resolvable:$true] %s166_s25 }
  0x10   :  { %60 = vmax.xlane.f32.xlu0 %v59_v7  ;;  %49 = vst.msk [vmem:[#allocation6] sm:$0xff] %vm44_vm0, %v283_v12  ;;  %s164_s22 = sshll.u32 %s288_s21, 4  ;;  %vm157_vm5 = vcmask 64552   ;;  %s165_s22 = int_to_ptr.vmem [resolvable:$true] %s164_s22 }
  0x13   :  { %v58_v13 = vld [vmem:[#allocation2] sm:$0xff] }
  0x14   :  { %v63_v17 = vld [vmem:[#allocation4] sm:$0xff] }
  0x15   :  { %v96_v47 = vld [vmem:[#allocation3] sm:$0xff] }
  0x16   :  { %v104_v52 = vld [vmem:[#allocation5] sm:$0xff] }
  0x17   :  { %v111_v53 = vld [vmem:[#allocation6] sm:$0xff] }
  0x18   :  { %65 = vmax.xlane.f32.xlu0 %v64_v10 }
  0x83   :  { %v61_v14 = vpop.xlane.xlu0 %60 }
  0x84   :  { %v62_v15 = vmax.f32 %v58_v13, %v61_v14 }
  0x86   :  { %v68_v16 = vsub.f32 %v58_v13, %v62_v15  ;;  %122 = vst.msk [vmem:[#allocation2] sm:$0xff] %vm44_vm0, %v62_v15  ;;  %76 = vperm.xlu1 %187, %v62_v15  }
  0x88   :  { %v69_v44 = vmul.f32 1.442695, %v68_v16 }
  0x8b   :  { %v66_v18 = vpop.xlane.xlu0 %65 }
  0x8c   :  { %v67_v19 = vmax.f32 %v63_v17, %v66_v18 }
  0x8d   :  { %v127_v20 = vld [vmem:[#allocation2] sm:$0xff] }
  0x8e   :  { %v71_v21 = vsub.f32 %v63_v17, %v67_v19  ;;  %123 = vst.msk [vmem:[#allocation4] sm:$0xff] %vm44_vm0, %v67_v19  ;;  %87 = vperm.xlu1 %187, %v67_v19  }
  0x8f   :  { %128 = vst.msk [vmem:[#allocation12] sm:$0xff] %vm44_vm0, %v127_v20 }
  0x90   :  { %v72_v45 = vmul.f32 1.442695, %v71_v21 }
  0x95   :  { %v136_v43 = vld [vmem:[#allocation4] sm:$0xff] }
  0xf8   :  { %v77_v22 = vpop.permute.xlu1 %76 }
  0xf9   :  { %v79_v23 = vsub.f32 %v52_v3, %v77_v22  ;;  %v80_v24 = vsub.f32 %v53_v4, %v77_v22 }
  0xfb   :  { %v81_v25 = vmul.f32 1.442695, %v79_v23  ;;  %v83_v26 = vmul.f32 1.442695, %v80_v24 }
  0xfd   :  { %189 = vpow2.f32 %v81_v25 }
  0xfe   :  { %191 = vpow2.f32 %v83_v26 }
 0x100   :  { %v88_v27 = vpop.permute.xlu1 %87 }
 0x101   :  { %v90_v28 = vsub.f32 %v56_v8, %v88_v27  ;;  %v91_v29 = vsub.f32 %v57_v9, %v88_v27 }
 0x103   :  { %v190_v30 = vpop.eup %189  ;;  %v92_v31 = vmul.f32 1.442695, %v90_v28  ;;  %v94_v32 = vmul.f32 1.442695, %v91_v29 }
 0x104   :  { %v192_v33 = vpop.eup %191 }
 0x105   :  { %193 = vpow2.f32 %v92_v31  ;;  %v98_v34 = vadd.f32 %v192_v33, %v190_v30 }
 0x106   :  { %195 = vpow2.f32 %v94_v32 }
 0x107   :  { %99 = vadd.xlane.f32.xlu2 %v98_v34  ;;  %197 = vpow2.f32 %v69_v44 }
 0x108   :  { %199 = vpow2.f32 %v72_v45 }
 0x10b   :  { %v194_v37 = vpop.eup %193 }
 0x10c   :  { %v196_v38 = vpop.eup %195  ;;  %v115_v39 = vmul.f32 %v194_v37, %v113_v35 }
 0x10d   :  { %v106_v40 = vadd.f32 %v196_v38, %v194_v37  ;;  %v116_v41 = vmul.f32 %v196_v38, %v114_v36  ;;  %v198_v46 = vpop.eup %197 }
 0x10e   :  { %v97_v48 = vmul.f32 %v198_v46, %v96_v47  ;;  %v200_v51 = vpop.eup %199 }
 0x10f   :  { %107 = vadd.xlane.f32.xlu2 %v106_v40  ;;  %v117_v42 = vadd.f32 %v116_v41, %v115_v39  ;;  %v105_v54 = vmul.f32 %v200_v51, %v104_v52  ;;  %v112_v57 = vmul.f32 %v200_v51, %v111_v53 }
 0x111   :  { %118 = vadd.xlane.f32.xlu0 %v117_v42 }
 0x127   :  { %138 = vrot.lane.b32.xlu2 %v136_v43, %s284_s0 }
 0x17a   :  { %v100_v49 = vpop.xlane.xlu2 %99 }
 0x17b   :  { %v101_v50 = vadd.f32 %v100_v49, %v97_v48 }
 0x17d   :  { %103 = vst.msk [vmem:[#allocation3] sm:$0xff] %vm44_vm0, %v101_v50 }
 0x182   :  { %v108_v55 = vpop.xlane.xlu2 %107 }
 0x183   :  { %v109_v56 = vadd.f32 %v108_v55, %v105_v54 }
 0x184   :  { %v119_v58 = vpop.xlane.xlu0 %118  ;;  %v129_v59 = vld [vmem:[#allocation3] sm:$0xff] }
 0x185   :  { %110 = vst.msk [vmem:[#allocation5] sm:$0xff] %vm44_vm0, %v109_v56  ;;  %v120_v60 = vadd.f32 %v119_v58, %v112_v57  ;;  %131 = vrot.lane.b32.xlu1 %v129_v59, %s285_s1 }
 0x187   :  { %121 = vst.msk [vmem:[#allocation6] sm:$0xff] %vm44_vm0, %v120_v60 }
 0x18a   :  { %v139_v0 = vpop.permute.xlu2 %138 }
 0x18c   :  { %v143_v61 = vld [vmem:[#allocation5] sm:$0xff] }
 0x18d   :  { %145 = vrot.lane.b32.xlu0 %v143_v61, %s286_s19 }
 0x18e   :  { %v150_v62 = vld [vmem:[#allocation6] sm:$0xff] }
 0x18f   :  { %152 = vrot.lane.b32.xlu1 %v150_v62, %s287_s20 }
 0x1f7   :  { %v132_v63 = vpop.permute.xlu1 %131 }
 0x1f8   :  { %135 = vst.msk [vmem:[#allocation12] sm:$0xff] %vm134_vm1, %v132_v63 }
 0x1f9   :  { %142 = vst.msk [vmem:[#allocation12] sm:$0xff] %vm141_vm2, %v139_v0 }
 0x1ff   :  { %v146_v1 = vpop.permute.xlu0 %145 }
 0x200   :  { %149 = vst.msk [vmem:[#allocation12] sm:$0xff] %vm148_vm3, %v146_v1 }
 0x201   :  { %v153_v2 = vpop.permute.xlu1 %152 }
 0x202   :  { %156 = vst.msk [vmem:[#allocation12] sm:$0xff] %vm155_vm4, %v153_v2 }
 0x203   :  { %158 = vst.msk [vmem:[#allocation12] sm:$0xff] %vm157_vm5, %v283_v12 }
 0x204   :  { %169 = dma.vmem_to_hbm [thread:$0]  %s165_s22, 128, %s167_s25, [#allocation9]  }
 0x205   :  { %277 = dma.done.wait [#allocation9], 128  }
 0x206   :  { %278 = vsyncadd [#allocation9], 4294967168 }
 0x207   :  { %174 = vsyncpa [#allocation8], 1 }
 0x208   :  { %175 = vsyncpa [#allocation11], 1 }
 0x209   :  { %176 = vsyncpa [#allocation9], 1 }

</bundles_post_ra>
